<compile_context>
chip_gen: v5e
topology: v5e:2x2
jax: 0.10.0
libtpu: 0.0.40
codegen_flags: <defaults>
</compile_context>

<pallas_src>
import functools

import jax
import jax.numpy as jnp
from jax.experimental import pallas as pl
from jax.experimental.pallas import tpu as pltpu


_SQRT_HALF = 0.7071067811865476


def _gelu_exact(x):
    # GeluAndMul(approximate="none") in vLLM -> erf-based GELU.  Computed in
    # f32 (the matmul accumulator dtype); VPU polynomial, hidden under MXU
    # slots once the kernel is compute-bound.
    return 0.5 * x * (1.0 + jax.lax.erf(x * _SQRT_HALF))


def _pixtral_mlp_kernel(x_ref, wg_ref, wu_ref, wd_ref, o_ref, acc_ref,
                        *, tile_i, resident):
    # x_ref:   [tile_s, H]
    # wg_ref:  resident: [I, H]     streaming: [tile_i, H]   (gate rows, torch layout)
    # wu_ref:  resident: [I, H]     streaming: [tile_i, H]   (up rows, torch layout)
    # wd_ref:  resident: [I, H]     streaming: [tile_i, H]   (down_proj.weight^T rows)
    # o_ref:   [tile_s, H]
    # acc_ref: [tile_s, H] f32 scratch, carried across the j (intermediate) axis.
    j = pl.program_id(1)
    nj = pl.num_programs(1)

    if resident:
        row = pl.multiple_of(j * tile_i, tile_i)
        wg = wg_ref[pl.ds(row, tile_i), :]
        wu = wu_ref[pl.ds(row, tile_i), :]
        wd = wd_ref[pl.ds(row, tile_i), :]
    else:
        wg = wg_ref[...]
        wu = wu_ref[...]
        wd = wd_ref[...]

    x = x_ref[...]
    # x @ W^T for gate/up (weights kept in PyTorch [out, in] layout):
    # contract x dim 1 with weight dim 1 -> (tile_s, tile_i).
    dn = (((1,), (1,)), ((), ()))
    gate = jax.lax.dot_general(x, wg, dn, preferred_element_type=jnp.float32)
    up = jax.lax.dot_general(x, wu, dn, preferred_element_type=jnp.float32)
    h = _gelu_exact(gate) * up
    # Down projection contribution of this intermediate tile, f32 accumulate.
    contrib = jnp.dot(h.astype(wd.dtype), wd, preferred_element_type=jnp.float32)

    @pl.when(j == 0)
    def _():
        acc_ref[...] = jnp.zeros_like(acc_ref)

    total = acc_ref[...] + contrib

    @pl.when(j < nj - 1)
    def _():
        acc_ref[...] = total

    @pl.when(j == nj - 1)
    def _():
        # Fused final accumulate + downcast straight into the output block.
        o_ref[...] = total.astype(o_ref.dtype)


def prepare_pixtral_mlp_weights(w_gate_up, w_down, *, compute_dtype=None):
    """One-time weight preprocessing (call at load time, NOT per forward).

    w_gate_up: [2*I, H]  merged gate_up_proj.weight (PyTorch layout).
    w_down:    [H, I]    down_proj.weight (PyTorch layout).

    Returns wg [I, H], wu [I, H], wd [I, H] (= down_proj.weight^T).  No tile
    size is baked into the layout, so any runtime tile_i is valid.  Pass
    compute_dtype=jnp.bfloat16 in production (f32 accumulation stays inside
    the kernel).
    """
    w_gate_up = jnp.asarray(w_gate_up)
    w_down = jnp.asarray(w_down)
    two_i, hidden = w_gate_up.shape
    inter = two_i // 2
    assert w_down.shape == (hidden, inter)
    wg = w_gate_up[:inter, :]
    wu = w_gate_up[inter:, :]
    wd = w_down.T
    if compute_dtype is not None:
        wg = wg.astype(compute_dtype)
        wu = wu.astype(compute_dtype)
        wd = wd.astype(compute_dtype)
    return wg, wu, wd


def _round_up(n, m):
    return ((n + m - 1) // m) * m


def _vmem_capacity_bytes():
    try:
        info = pltpu.get_tpu_info()
        cap = getattr(info, "vmem_capacity_bytes", None)
        if cap:
            return int(cap)
    except Exception:
        pass
    # Conservative fallback (v7x per-core VMEM is the smallest of the fleet).
    return 64 * 1024 * 1024


def pixtral_hf_mlp(x, wg, wu, wd, *, tile_s=None, tile_i=None,
                   weights_resident=None):
    """Fused PixtralHFMLP forward.

    x:          [S, H]
    wg/wu/wd:   prepared weights from prepare_pixtral_mlp_weights, each [I, H].
    """
    S, H = x.shape
    I, H2 = wg.shape
    assert H2 == H and wu.shape == (I, H) and wd.shape == (I, H)

    out_dtype = x.dtype
    # Keep activations and weights in the same dtype (bf16 in production) so
    # the MXU runs at its native rate; accumulation is f32 inside the kernel.
    if x.dtype != wg.dtype:
        x = x.astype(wg.dtype)

    x_item = jnp.dtype(x.dtype).itemsize
    w_item = jnp.dtype(wg.dtype).itemsize
    o_item = jnp.dtype(out_dtype).itemsize

    # --- intermediate-dim tile --------------------------------------------
    if tile_i is None:
        tile_i = I  # single j step fallback (odd intermediate sizes)
        if I % 128 == 0:
            for t in (512, 256, 128):
                if I % t == 0:
                    tile_i = t
                    break
    assert I % tile_i == 0, "tile_i must divide intermediate_size"
    n_j = I // tile_i

    # --- VMEM budget & resident-vs-streaming decision -----------------------
    vmem_ceiling = _vmem_capacity_bytes() - (8 << 20)   # Mosaic scratch headroom
    weight_bytes_total = 3 * I * H * w_item              # wg + wu + wd, single copy

    def _nonweight_bytes(ts):
        return (
            2 * ts * H * x_item                 # x double buffer
            + 2 * ts * H * o_item               # out double buffer
            + ts * H * 4                        # f32 accumulator scratch
            + ts * tile_i * (3 * 4 + w_item)    # gate/up/h f32 temporaries + cast
        )

    if weights_resident is None:
        weights_resident = (
            weight_bytes_total + _nonweight_bytes(min(512, _round_up(S, 8)))
            <= vmem_ceiling
        )

    # --- sequence tile (pad S instead of full-dim fallback) -----------------
    if tile_s is None:
        # Resident weights: 512 rows keep the MXU busy on all generations.
        # Streaming weights: ~1024 rows of reuse per weight byte are needed to
        # clear the v6e HBM roofline (~650 flop/byte); still fits VMEM on v7x.
        cap = 512 if weights_resident else 1024
        tile_s = cap if S >= cap else _round_up(max(S, 8), 8)
    s_pad = _round_up(S, tile_s)
    if s_pad > tile_s:
        assert tile_s % 8 == 0, "tile_s must be a multiple of 8 when S > tile_s"
    n_i = s_pad // tile_s
    if s_pad != S:
        x = jnp.pad(x, ((0, s_pad - S), (0, 0)))

    # --- specs ---------------------------------------------------------------
    x_spec = pl.BlockSpec((tile_s, H), lambda i, j: (i, 0))
    out_spec = pl.BlockSpec((tile_s, H), lambda i, j: (i, 0))
    if weights_resident:
        # Whole weight mats live in VMEM for the duration of the call: DMA'd
        # from HBM exactly once per core, never re-streamed per sequence tile.
        w_spec = pl.BlockSpec(memory_space=pltpu.MemorySpace.VMEM)
        in_specs = [x_spec, w_spec, w_spec, w_spec]
        w_vmem = weight_bytes_total
    else:
        wt_spec = pl.BlockSpec((tile_i, H), lambda i, j: (j, 0))
        in_specs = [x_spec, wt_spec, wt_spec, wt_spec]
        w_vmem = 2 * 3 * tile_i * H * w_item    # double-buffered weight tiles

    vmem_est = w_vmem + _nonweight_bytes(tile_s)
    vmem_limit = int(min(vmem_ceiling, vmem_est + vmem_est // 4 + (2 << 20)))
    vmem_limit = max(vmem_limit, 16 << 20)

    weight_stream_factor = 1 if weights_resident else n_i
    cost = pl.CostEstimate(
        flops=6 * s_pad * H * I,                    # 2*S*H*2I + 2*S*I*H
        transcendentals=s_pad * I,                  # one erf per gate element
        bytes_accessed=(
            s_pad * H * x_item + s_pad * H * o_item
            + weight_stream_factor * 3 * I * H * w_item
        ),
    )

    kernel = functools.partial(
        _pixtral_mlp_kernel, tile_i=tile_i, resident=weights_resident
    )

    out = pl.pallas_call(
        kernel,
        out_shape=jax.ShapeDtypeStruct((s_pad, H), out_dtype),
        grid_spec=pltpu.PrefetchScalarGridSpec(
            num_scalar_prefetch=0,
            grid=(n_i, n_j),
            in_specs=in_specs,
            out_specs=out_spec,
            scratch_shapes=[pltpu.VMEM((tile_s, H), jnp.float32)],
        ),
        compiler_params=pltpu.CompilerParams(
            dimension_semantics=("parallel", "arbitrary"),
            vmem_limit_bytes=vmem_limit,
        ),
        cost_estimate=cost,
    )(x, wg, wu, wd)

    if s_pad != S:
        out = out[:S]
    return out


def _reference(x, w_gate_up, w_down):
    inter = w_gate_up.shape[0] // 2
    gate_up = jnp.dot(x, w_gate_up.T, precision="highest")
    gate, up = gate_up[:, :inter], gate_up[:, inter:]
    h = _gelu_exact(gate) * up
    return jnp.dot(h, w_down.T, precision="highest")


if __name__ == "__main__":
    # Small synthetic config: seq=72 (deliberately not a multiple of the seq
    # tile, exercising the padding path), hidden=32, intermediate=256.
    S, H, I = 72, 32, 256

    key = jax.random.PRNGKey(0)
    k1, k2, k3 = jax.random.split(key, 3)
    x = jax.random.normal(k1, (S, H), dtype=jnp.float32)
    # gate_up_proj.weight: [2*I, H]; down_proj.weight: [H, I] (PyTorch layouts).
    w_gate_up = jax.random.normal(k2, (2 * I, H), dtype=jnp.float32) * 0.05
    w_down = jax.random.normal(k3, (H, I), dtype=jnp.float32) * 0.05

    # One-time weight preparation (split gate/up, transpose down_proj).  Test
    # keeps f32 to compare tightly; production: compute_dtype=jnp.bfloat16.
    wg, wu, wd = prepare_pixtral_mlp_weights(w_gate_up, w_down)

    ref = _reference(x, w_gate_up, w_down)

    # 1) Resident-weight path, grid (2, 2) with S padded 72 -> 80.
    out_res = pixtral_hf_mlp(x, wg, wu, wd, tile_s=40, tile_i=128,
                             weights_resident=True)
    out_res = jax.block_until_ready(out_res)
    assert out_res.shape == (S, H)
    assert jnp.allclose(out_res, ref, atol=1e-4, rtol=1e-4), \
        "resident-weight kernel mismatch vs reference"

    # 2) Streaming-weight fallback path (weights blocked along the I axis).
    out_str = pixtral_hf_mlp(x, wg, wu, wd, tile_s=40, tile_i=128,
                             weights_resident=False)
    out_str = jax.block_until_ready(out_str)
    assert jnp.allclose(out_str, ref, atol=1e-4, rtol=1e-4), \
        "streaming-weight kernel mismatch vs reference"

    # 3) Fully automatic tiling / residency decision (grid collapses to (1, 1)).
    out_auto = pixtral_hf_mlp(x, wg, wu, wd)
    out_auto = jax.block_until_ready(out_auto)
    assert jnp.allclose(out_auto, ref, atol=1e-4, rtol=1e-4), \
        "auto-config kernel mismatch vs reference"

    print("KERNEL_OK")
</pallas_src>

<mosaic_0001>
module attributes {stable_mosaic.version = 11 : i64} {
  func.func @_pixtral_mlp_kernel(%arg0: i32, %arg1: i32, %arg2: memref<40x32xf32, #tpu.memory_space<vmem>>, %arg3: memref<256x32xf32, #tpu.memory_space<vmem>>, %arg4: memref<256x32xf32, #tpu.memory_space<vmem>>, %arg5: memref<256x32xf32, #tpu.memory_space<vmem>>, %arg6: memref<40x32xf32, #tpu.memory_space<vmem>>, %arg7: memref<40x32xf32, #tpu.memory_space<vmem>>) attributes {dimension_semantics = [#tpu.dimension_semantics<parallel>, #tpu.dimension_semantics<arbitrary>], iteration_bounds = array<i64: 2, 2>, scalar_prefetch = 0 : i64, scratch_operands = 1 : i64, tpu.core_type = #tpu.core_type<tc>, window_params = [{transform_indices = @transform_0, window_bounds = array<i64: 40, 32>}, {pipeline_mode = #tpu.pipeline_mode<synchronous>, transform_indices = @transform_1, window_bounds = array<i64: 256, 32>}, {pipeline_mode = #tpu.pipeline_mode<synchronous>, transform_indices = @transform_2, window_bounds = array<i64: 256, 32>}, {pipeline_mode = #tpu.pipeline_mode<synchronous>, transform_indices = @transform_3, window_bounds = array<i64: 256, 32>}, {transform_indices = @transform_4, window_bounds = array<i64: 40, 32>}]} {
    %c128_i32 = arith.constant 128 : i32
    %0 = arith.muli %arg1, %c128_i32 : i32
    %1 = tpu.assume_multiple %0, 128 : i32
    %2 = arith.index_cast %1 : i32 to index
    %c0 = arith.constant 0 : index
    %3 = vector.load %arg3[%2, %c0] : memref<256x32xf32, #tpu.memory_space<vmem>>, vector<128x32xf32>
    %4 = arith.index_cast %1 : i32 to index
    %c0_0 = arith.constant 0 : index
    %5 = vector.load %arg4[%4, %c0_0] : memref<256x32xf32, #tpu.memory_space<vmem>>, vector<128x32xf32>
    %6 = arith.index_cast %1 : i32 to index
    %c0_1 = arith.constant 0 : index
    %7 = vector.load %arg5[%6, %c0_1] : memref<256x32xf32, #tpu.memory_space<vmem>>, vector<128x32xf32>
    %c0_2 = arith.constant 0 : index
    %c0_3 = arith.constant 0 : index
    %8 = vector.load %arg2[%c0_2, %c0_3] : memref<40x32xf32, #tpu.memory_space<vmem>>, vector<40x32xf32>
    %cst = arith.constant dense<0.000000e+00> : vector<40x128xf32>
    %9 = tpu.matmul %8, %3, %cst {dimension_numbers = #tpu.dot_dimension_numbers<[1], [1], [0], [0], [0, 0, 1, 0], [], []>} : vector<40x32xf32>, vector<128x32xf32>, vector<40x128xf32> -> vector<40x128xf32>
    %cst_4 = arith.constant dense<0.000000e+00> : vector<40x128xf32>
    %10 = tpu.matmul %8, %5, %cst_4 {dimension_numbers = #tpu.dot_dimension_numbers<[1], [1], [0], [0], [0, 0, 1, 0], [], []>} : vector<40x32xf32>, vector<128x32xf32>, vector<40x128xf32> -> vector<40x128xf32>
    %cst_5 = arith.constant 5.000000e-01 : f32
    %11 = vector.broadcast %cst_5 : f32 to vector<40x128xf32>
    %12 = arith.mulf %11, %9 : vector<40x128xf32>
    %cst_6 = arith.constant 0.707106769 : f32
    %13 = vector.broadcast %cst_6 : f32 to vector<40x128xf32>
    %14 = arith.mulf %9, %13 : vector<40x128xf32>
    %15 = math.erf %14 : vector<40x128xf32>
    %cst_7 = arith.constant 1.000000e+00 : f32
    %16 = vector.broadcast %cst_7 : f32 to vector<40x128xf32>
    %17 = arith.addf %16, %15 : vector<40x128xf32>
    %18 = arith.mulf %12, %17 : vector<40x128xf32>
    %19 = arith.mulf %18, %10 : vector<40x128xf32>
    %cst_8 = arith.constant dense<0.000000e+00> : vector<40x32xf32>
    %20 = tpu.matmul %19, %7, %cst_8 {dimension_numbers = #tpu.dot_dimension_numbers<[1], [0], [0], [1], [0, 0, 1, 1], [], []>} : vector<40x128xf32>, vector<128x32xf32>, vector<40x32xf32> -> vector<40x32xf32>
    %c0_i32 = arith.constant 0 : i32
    %21 = arith.cmpi eq, %arg1, %c0_i32 : i32
    %22 = arith.extui %21 : i1 to i32
    %c0_i32_9 = arith.constant 0 : i32
    %23 = arith.cmpi ne, %22, %c0_i32_9 : i32
    scf.if %23 {
      %cst_15 = arith.constant 0.000000e+00 : f32
      %32 = vector.broadcast %cst_15 : f32 to vector<40x32xf32>
      %c0_16 = arith.constant 0 : index
      %c0_17 = arith.constant 0 : index
      %33 = vector.load %arg7[%c0_16, %c0_17] : memref<40x32xf32, #tpu.memory_space<vmem>>, vector<40x32xf32>
      tpu.vector_store %arg7[%c0_16, %c0_17], %32 {strides = array<i32>} : memref<40x32xf32, #tpu.memory_space<vmem>>, vector<40x32xf32>,
    } else {
    }
    %c0_10 = arith.constant 0 : index
    %c0_11 = arith.constant 0 : index
    %24 = vector.load %arg7[%c0_10, %c0_11] : memref<40x32xf32, #tpu.memory_space<vmem>>, vector<40x32xf32>
    %25 = arith.addf %24, %20 : vector<40x32xf32>
    %c1_i32 = arith.constant 1 : i32
    %26 = arith.cmpi slt, %arg1, %c1_i32 : i32
    %27 = arith.extui %26 : i1 to i32
    %c0_i32_12 = arith.constant 0 : i32
    %28 = arith.cmpi ne, %27, %c0_i32_12 : i32
    scf.if %28 {
      %c0_15 = arith.constant 0 : index
      %c0_16 = arith.constant 0 : index
      %32 = vector.load %arg7[%c0_15, %c0_16] : memref<40x32xf32, #tpu.memory_space<vmem>>, vector<40x32xf32>
      tpu.vector_store %arg7[%c0_15, %c0_16], %25 {strides = array<i32>} : memref<40x32xf32, #tpu.memory_space<vmem>>, vector<40x32xf32>,
    } else {
    }
    %c1_i32_13 = arith.constant 1 : i32
    %29 = arith.cmpi eq, %arg1, %c1_i32_13 : i32
    %30 = arith.extui %29 : i1 to i32
    %c0_i32_14 = arith.constant 0 : i32
    %31 = arith.cmpi ne, %30, %c0_i32_14 : i32
    scf.if %31 {
      %c0_15 = arith.constant 0 : index
      %c0_16 = arith.constant 0 : index
      %32 = vector.load %arg6[%c0_15, %c0_16] : memref<40x32xf32, #tpu.memory_space<vmem>>, vector<40x32xf32>
      tpu.vector_store %arg6[%c0_15, %c0_16], %25 {strides = array<i32>} : memref<40x32xf32, #tpu.memory_space<vmem>>, vector<40x32xf32>,
    } else {
    }
    return
  }
  func.func @transform_0(%arg0: i32, %arg1: i32) -> (i32, i32) {
    %c0_i32 = arith.constant 0 : i32
    %c0_i32_0 = arith.constant 0 : i32
    return %arg0, %c0_i32 : i32, i32
  }
  func.func @transform_1(%arg0: i32, %arg1: i32) -> (i32, i32) {
    %c0_i32 = arith.constant 0 : i32
    %c0_i32_0 = arith.constant 0 : i32
    %c0_i32_1 = arith.constant 0 : i32
    return %c0_i32, %c0_i32_0 : i32, i32
  }
  func.func @transform_2(%arg0: i32, %arg1: i32) -> (i32, i32) {
    %c0_i32 = arith.constant 0 : i32
    %c0_i32_0 = arith.constant 0 : i32
    %c0_i32_1 = arith.constant 0 : i32
    return %c0_i32, %c0_i32_0 : i32, i32
  }
  func.func @transform_3(%arg0: i32, %arg1: i32) -> (i32, i32) {
    %c0_i32 = arith.constant 0 : i32
    %c0_i32_0 = arith.constant 0 : i32
    %c0_i32_1 = arith.constant 0 : i32
    return %c0_i32, %c0_i32_0 : i32, i32
  }
  func.func @transform_4(%arg0: i32, %arg1: i32) -> (i32, i32) {
    %c0_i32 = arith.constant 0 : i32
    %c0_i32_0 = arith.constant 0 : i32
    return %arg0, %c0_i32 : i32, i32
  }
}

</mosaic_0001>

<bundles_post_ra>
// kernel: tpu_custom_call.1
= control target key start
LH: loop header
LB: loop body
LE: loop exit
PB: predicated region body
PF: predicated region fallthrough
CT: control target
= control target key end

     0   :  { %s1007_s15 = smov 0   ;;  %s1009_s16 = smov 0   ;;  %s1359_s0 = inlined_call_operand.vmem [shape: f32[80,32], index: 0, kind: input, shape index: {}]   ;;  %s1360_s1 = inlined_call_operand.vmem [shape: f32[256,32], index: 1, kind: input, shape index: {}]   ;;  %s1361_s2 = inlined_call_operand.vmem [shape: f32[256,32], index: 2, kind: input, shape index: {}]   ;;  %s1362_s3 = inlined_call_operand.vmem [shape: f32[256,32], index: 3, kind: input, shape index: {}]   ;;  %s1363_s4 = inlined_call_operand.vmem [shape: f32[80,32], index: 4, kind: output, shape index: {}]  }
   0x1   :  { %s1011_s17 = smov 0   ;;  %s1013_s18 = smov 0  }
   0x2   :  { %s1015_s19 = smov 0  }
   0x3 LB: > { %s23_s20 = sadd.s32 1, %s971_s17  ;;  %s26_s21 = sadd.s32 1, %s975_s18  ;;  %s979_s19 = sphi %s1015_s19, %s14_s19   ;;  %s975_s18 = sphi %s1013_s18, %s1367_s18   ;;  %s971_s17 = sphi %s1011_s17, %s1366_s17   ;;  %s967_s16 = sphi %s1009_s16, %s1365_s16   ;;  %s963_s15 = sphi %s1007_s15, %s1364_s15  }
   0x4   : > { %p24_p0 = scmp.ge.s32.totalorder %s23_s20, 2  ;;  %p818_p1 = scmp.ge.s32.totalorder %s979_s19, 1 }
   0x5   : > { %p175_p2 = scmp.lt.s32.totalorder %s979_s19, 5 }
   0x6   : > { %s1369_s20 = smov (%p24_p0, %s23_s20), 0  ;;  %s1371_s21 = smov (!%p24_p0, %s26_s21), %s975_s18 }
   0x7   : > { %p176_p3 = pnand %p818_p1, %p175_p2  ;;  %p28_p4 = scmp.ge.s32.totalorder %s1371_s21, 2 }
   0x8   : > { %s1040_s22 = sshll.u32 (!%p176_p3), %s963_s15, 7  ;;  %s201_s23 = smul.u32 (!%p176_p3), 5, %s967_s16 }
   0x9   : > { %s1373_s21 = smov (%p28_p4, %s1371_s21), 0  ;;  %179 = sbr.rel (%p176_p3) target bundleno = 461 (0x1cd), region = 36 }
   0xa   : > { %s1046_s26 = scalar_lea.vmem (!%p176_p3), %s1360_s1, %s1040_s22  ;;  %s1053_s29 = scalar_lea.vmem (!%p176_p3), %s1361_s2, %s1040_s22 }
   0xb   : > { %p202_p5 = scmp.lt.s32.totalorder (!%p176_p3), %s201_s23, 9  ;;  %s1163_s13 = scalar_lea.vmem (!%p176_p3), %s1362_s3, %s1040_s22 }
   0xc   : > { %p869_p6 = scmp.ne.s32.totalorder (!%p176_p3), %s963_s15, 0 }
   0xe   : > { %vm270_vm0 = vcmask 261120   ;;  %v230_v0 = vld [vmem:[%s1046_s26 + $0x78] sm:$0xff]  ;;  %v229_v1 = vld [vmem:[%s1046_s26 + $0x70] sm:$0xff]  ;;  %s1375_s23 = smov (!%p202_p5, %s201_s23), 9  ;;  %v228_v4 = vld [vmem:[%s1046_s26 + $0x68] sm:$0xff] }
   0xf   : > { %822 = vmatpush.xpose.msk.msra.mxu0 %vm270_vm0, %v230_v0  ;;  %874 = vmatpush.xpose.msk.msra.mxu3 %vm270_vm0, %v230_v0  ;;  %v247_v2 = vld [vmem:[%s1053_s29 + $0x78] sm:$0xff]  ;;  %s819_s30 = sshll.u32 %s1375_s23, 3  ;;  %v246_v3 = vld [vmem:[%s1053_s29 + $0x70] sm:$0xff]  ;;  %v245_v5 = vld [vmem:[%s1053_s29 + $0x68] sm:$0xff] }
  0x10   : > { %843 = vmatpush.xpose.msk.msra.mxu1 %vm270_vm0, %v247_v2  ;;  %s1071_s7 = scalar_lea.vmem %s1363_s4, %s819_s30  ;;  %v227_v6 = vld [vmem:[%s1046_s26 + $0x60] sm:$0xff]  ;;  %v226_v8 = vld [vmem:[%s1046_s26 + $0x58] sm:$0xff]  ;;  %v225_v10 = vld [vmem:[%s1046_s26 + $0x50] sm:$0xff]  ;;  %s205_s10 = scalar_lea.vmem %s1359_s0, %s819_s30 }
  0x11   : > { %v244_v7 = vld [vmem:[%s1053_s29 + $0x60] sm:$0xff]  ;;  %v243_v9 = vld [vmem:[%s1053_s29 + $0x58] sm:$0xff]  ;;  %v242_v11 = vld [vmem:[%s1053_s29 + $0x50] sm:$0xff] }
  0x12   : > { %v224_v12 = vld [vmem:[%s1046_s26 + $0x48] sm:$0xff]  ;;  %v223_v14 = vld [vmem:[%s1046_s26 + $0x40] sm:$0xff]  ;;  %v222_v16 = vld [vmem:[%s1046_s26 + $0x38] sm:$0xff] }
  0x13   : > { %823 = vmatpush.xpose.msk.msra.mxu0 %vm270_vm0, %v229_v1  ;;  %875 = vmatpush.xpose.msk.msra.mxu3 %vm270_vm0, %v229_v1  ;;  %v241_v13 = vld [vmem:[%s1053_s29 + $0x48] sm:$0xff]  ;;  %v240_v15 = vld [vmem:[%s1053_s29 + $0x40] sm:$0xff]  ;;  %v239_v17 = vld [vmem:[%s1053_s29 + $0x38] sm:$0xff] }
  0x14   : > { %844 = vmatpush.xpose.msk.msra.mxu1 %vm270_vm0, %v246_v3  ;;  %v221_v18 = vld [vmem:[%s1046_s26 + $0x30] sm:$0xff]  ;;  %v220_v20 = vld [vmem:[%s1046_s26 + $0x28] sm:$0xff]  ;;  %v219_v22 = vld [vmem:[%s1046_s26 + $0x20] sm:$0xff] }
  0x15   : > { %v238_v19 = vld [vmem:[%s1053_s29 + $0x30] sm:$0xff]  ;;  %v237_v21 = vld [vmem:[%s1053_s29 + $0x28] sm:$0xff]  ;;  %v236_v23 = vld [vmem:[%s1053_s29 + $0x20] sm:$0xff] }
  0x16   : > { %v218_v24 = vld [vmem:[%s1046_s26 + $0x18] sm:$0xff]  ;;  %v217_v26 = vld [vmem:[%s1046_s26 + $0x10] sm:$0xff]  ;;  %v216_v28 = vld [vmem:[%s1046_s26 + $0x8] sm:$0xff] }
  0x17   : > { %824 = vmatpush.xpose.msk.msra.mxu0 %vm270_vm0, %v228_v4  ;;  %876 = vmatpush.xpose.msk.msra.mxu3 %vm270_vm0, %v228_v4  ;;  %v235_v25 = vld [vmem:[%s1053_s29 + $0x18] sm:$0xff]  ;;  %v234_v27 = vld [vmem:[%s1053_s29 + $0x10] sm:$0xff]  ;;  %v233_v29 = vld [vmem:[%s1053_s29 + $0x8] sm:$0xff] }
  0x18   : > { %845 = vmatpush.xpose.msk.msra.mxu1 %vm270_vm0, %v245_v5  ;;  %v215_v30 = vld [vmem:[%s1046_s26] sm:$0xff]  ;;  %v268_v32 = vld [vmem:[%s205_s10 + $0x18] sm:$0xff]  ;;  %v266_v34 = vld [vmem:[%s205_s10 + $0x8] sm:$0xff] }
  0x19   : > { %v265_v31 = vld [vmem:[%s205_s10] sm:$0xff]  ;;  %v267_v36 = vld [vmem:[%s205_s10 + $0x10] sm:$0xff]  ;;  %v264_v37 = vld [vmem:[%s1163_s13 + $0x78] sm:$0xff] }
  0x1a   : > { %v232_v33 = vld [vmem:[%s1053_s29] sm:$0xff]  ;;  %671 = vmatpush.msra.mxu2 %v264_v37  ;;  %v263_v38 = vld [vmem:[%s1163_s13 + $0x70] sm:$0xff]  ;;  %v262_v39 = vld [vmem:[%s1163_s13 + $0x68] sm:$0xff] }
  0x1b   : > { %825 = vmatpush.xpose.msk.msra.mxu0 %vm270_vm0, %v227_v6  ;;  %877 = vmatpush.xpose.msk.msra.mxu3 %vm270_vm0, %v227_v6  ;;  %v269_v35 = vld [vmem:[%s205_s10 + $0x20] sm:$0xff]  ;;  %v260_v43 = vld [vmem:[%s1163_s13 + $0x58] sm:$0xff]  ;;  %v259_v47 = vld [vmem:[%s1163_s13 + $0x50] sm:$0xff] }
  0x1c   : > { %846 = vmatpush.xpose.msk.msra.mxu1 %vm270_vm0, %v244_v7  ;;  %672 = vmatpush.msra.mxu2 %v263_v38  ;;  %v261_v40 = vld [vmem:[%s1163_s13 + $0x60] sm:$0xff]  ;;  %v258_v52 = vld [vmem:[%s1163_s13 + $0x48] sm:$0xff]  ;;  %v256_v61 = vld [vmem:[%s1163_s13 + $0x38] sm:$0xff] }
  0x1d   : > { %v257_v57 = vld [vmem:[%s1163_s13 + $0x40] sm:$0xff] }
  0x1e   : > { %673 = vmatpush.msra.mxu2 %v262_v39  ;;  %v253_v38 = vld [vmem:[%s1163_s13 + $0x20] sm:$0xff] }
  0x1f   : > { %826 = vmatpush.xpose.msk.msra.mxu0 %vm270_vm0, %v226_v8  ;;  %878 = vmatpush.xpose.msk.msra.mxu3 %vm270_vm0, %v226_v8 }
  0x20   : > { %847 = vmatpush.xpose.msk.msra.mxu1 %vm270_vm0, %v243_v9  ;;  %674 = vmatpush.msra.mxu2 %v261_v40 }
  0x22   : > { %675 = vmatpush.msra.mxu2 %v260_v43 }
  0x23   : > { %827 = vmatpush.xpose.msk.msra.mxu0 %vm270_vm0, %v225_v10  ;;  %879 = vmatpush.xpose.msk.msra.mxu3 %vm270_vm0, %v225_v10 }
  0x24   : > { %848 = vmatpush.xpose.msk.msra.mxu1 %vm270_vm0, %v242_v11  ;;  %676 = vmatpush.msra.mxu2 %v259_v47 }
  0x26   : > { %677 = vmatpush.msra.mxu2 %v258_v52 }
  0x27   : > { %828 = vmatpush.xpose.msk.msra.mxu0 %vm270_vm0, %v224_v12  ;;  %880 = vmatpush.xpose.msk.msra.mxu3 %vm270_vm0, %v224_v12 }
  0x28   : > { %849 = vmatpush.xpose.msk.msra.mxu1 %vm270_vm0, %v241_v13  ;;  %678 = vmatpush.msra.mxu2 %v257_v57 }
  0x2a   : > { %679 = vmatpush.msra.mxu2 %v256_v61 }
  0x2b   : > { %829 = vmatpush.xpose.msk.msra.mxu0 %vm270_vm0, %v223_v14  ;;  %881 = vmatpush.xpose.msk.msra.mxu3 %vm270_vm0, %v223_v14 }
  0x2c   : > { %850 = vmatpush.xpose.msk.msra.mxu1 %vm270_vm0, %v240_v15 }
  0x2f   : > { %830 = vmatpush.xpose.msk.msra.mxu0 %vm270_vm0, %v222_v16  ;;  %882 = vmatpush.xpose.msk.msra.mxu3 %vm270_vm0, %v222_v16 }
  0x30   : > { %851 = vmatpush.xpose.msk.msra.mxu1 %vm270_vm0, %v239_v17 }
  0x33   : > { %831 = vmatpush.xpose.msk.msra.mxu0 %vm270_vm0, %v221_v18  ;;  %883 = vmatpush.xpose.msk.msra.mxu3 %vm270_vm0, %v221_v18 }
  0x34   : > { %852 = vmatpush.xpose.msk.msra.mxu1 %vm270_vm0, %v238_v19 }
  0x37   : > { %832 = vmatpush.xpose.msk.msra.mxu0 %vm270_vm0, %v220_v20  ;;  %884 = vmatpush.xpose.msk.msra.mxu3 %vm270_vm0, %v220_v20 }
  0x38   : > { %853 = vmatpush.xpose.msk.msra.mxu1 %vm270_vm0, %v237_v21 }
  0x3b   : > { %833 = vmatpush.xpose.msk.msra.mxu0 %vm270_vm0, %v219_v22  ;;  %885 = vmatpush.xpose.msk.msra.mxu3 %vm270_vm0, %v219_v22 }
  0x3c   : > { %854 = vmatpush.xpose.msk.msra.mxu1 %vm270_vm0, %v236_v23 }
  0x3f   : > { %834 = vmatpush.xpose.msk.msra.mxu0 %vm270_vm0, %v218_v24  ;;  %886 = vmatpush.xpose.msk.msra.mxu3 %vm270_vm0, %v218_v24  ;;  %v255_v24 = vld [vmem:[%s1163_s13 + $0x30] sm:$0xff] }
  0x40   : > { %855 = vmatpush.xpose.msk.msra.mxu1 %vm270_vm0, %v235_v25  ;;  %680 = vmatpush.msra.mxu2 %v255_v24 }
  0x43   : > { %835 = vmatpush.xpose.msk.msra.mxu0 %vm270_vm0, %v217_v26  ;;  %887 = vmatpush.xpose.msk.msra.mxu3 %vm270_vm0, %v217_v26 }
  0x44   : > { %856 = vmatpush.xpose.msk.msra.mxu1 %vm270_vm0, %v234_v27 }
  0x47   : > { %836 = vmatpush.xpose.msk.msra.mxu0 %vm270_vm0, %v216_v28  ;;  %888 = vmatpush.xpose.msk.msra.mxu3 %vm270_vm0, %v216_v28 }
  0x48   : > { %857 = vmatpush.xpose.msk.msra.mxu1 %vm270_vm0, %v233_v29 }
  0x4b   : > { %837 = vmatpush.xpose.msk.msra.mxu0 %vm270_vm0, %v215_v30  ;;  %889 = vmatpush.xpose.msk.msra.mxu3 %vm270_vm0, %v215_v30 }
  0x4c   : > { %858 = vmatpush.xpose.msk.msra.mxu1 %vm270_vm0, %v232_v33 }
  0x4e   : > { %838 = vmatmul.msk.f32.vlgmr.msra.gmra.mxu0 %vm270_vm0, %v265_v31  ;;  %841 = vmatmul.msk.f32.vlgmr.msra.gmra.mxu3 %vm270_vm0, %v268_v32 }
  0x4f   : > { %859 = vmatmul.msk.f32.vlgmr.msra.gmra.mxu1 %vm270_vm0, %v265_v31 }
  0x56   : > { %839 = vmatmul.msk.f32.gmra.mxu0 %vm270_vm0, %v266_v34  ;;  %842 = vmatmul.msk.f32.gmra.mxu3 %vm270_vm0, %v269_v35 }
  0x57   : > { %860 = vmatmul.msk.f32.gmra.mxu1 %vm270_vm0, %v266_v34 }
  0x5e   : > { %840 = vmatmul.msk.f32.gmra.mxu0 %vm270_vm0, %v267_v36 }
  0x5f   : > { %861 = vmatmul.msk.f32.gmra.mxu1 %vm270_vm0, %v267_v36 }
  0x67   : > { %862 = vmatmul.msk.f32.gmra.mxu1 %vm270_vm0, %v268_v32 }
  0x6f   : > { %863 = vmatmul.msk.f32.gmra.mxu1 %vm270_vm0, %v269_v35  ;;  %v254_v35 = vld [vmem:[%s1163_s13 + $0x28] sm:$0xff] }
  0x70   : > { %681 = vmatpush.msra.mxu2 %v254_v35 }
  0x72   : > { %682 = vmatpush.msra.mxu2 %v253_v38 }
  0xcb   : > { %v1169_v41 = vpop.f32.mrf.mxu0 }
  0xcc   : > { %v1172_v42 = vmul.f32 0.70710677, %v1169_v41 }
  0xce   : > { %v456_v44 = vmul.f32 %v1172_v42, %v1172_v42 }
  0xd0   : > { %v1177_v45 = vmin.f32 %v456_v44, 16.0 }
  0xd1   : > { %v1179_v46 = vpop.f32.mrf.mxu3 }
  0xd2   : > { %v458_v48 = vmul.f32 2.1237322e-06, %v1177_v45  ;;  %v1184_v49 = vmul.f32 0.70710677, %v1179_v46  ;;  %v469_v51 = vmul.f32 3.8918573e-05, %v1177_v45 }
  0xd3   : > { %v1186_v50 = vpop.f32.mrf.mxu0 }
  0xd4   : > { %v459_v53 = vadd.f32 0.00028619796, %v458_v48  ;;  %v576_v54 = vmul.f32 %v1184_v49, %v1184_v49  ;;  %v1193_v55 = vmul.f32 0.70710677, %v1186_v50  ;;  %v470_v56 = vadd.f32 0.001143296, %v469_v51 }
  0xd5   : > { %v252_v51 = vld [vmem:[%s1163_s13 + $0x18] sm:$0xff] }
  0xd6   : > { %v496_v58 = vmul.f32 %v1193_v55, %v1193_v55  ;;  %v1198_v59 = vmin.f32 %v576_v54, 16.0  ;;  %v471_v60 = vmul.f32 %v470_v56, %v1177_v45  ;;  %v460_v62 = vmul.f32 %v459_v53, %v1177_v45  ;;  %683 = vmatpush.msra.mxu2 %v252_v51 }
  0xd8   : > { %v1203_v63 = vmin.f32 %v496_v58, 16.0  ;;  %v472_v1 = vadd.f32 0.014752088, %v471_v60  ;;  %v589_v5 = vmul.f32 3.8918573e-05, %v1198_v59  ;;  %v251_v58 = vld [vmem:[%s1163_s13 + $0x10] sm:$0xff] }
  0xd9   : > { %v1205_v0 = vpop.f32.mrf.mxu3  ;;  %v461_v6 = vadd.f32 0.0036580483, %v460_v62  ;;  %v578_v7 = vmul.f32 2.1237322e-06, %v1198_v59  ;;  %684 = vmatpush.msra.mxu2 %v251_v58 }
  0xda   : > { %v1208_v2 = vmul.f32 0.70710677, %v1205_v0  ;;  %v473_v4 = vmul.f32 %v472_v1, %v1177_v45  ;;  %v509_v11 = vmul.f32 3.8918573e-05, %v1203_v63  ;;  %v498_v12 = vmul.f32 2.1237322e-06, %v1203_v63 }
  0xdb   : > { %v1210_v3 = vpop.f32.mrf.mxu0  ;;  %v590_v16 = vadd.f32 0.001143296, %v589_v5  ;;  %v462_v17 = vmul.f32 %v461_v6, %v1177_v45  ;;  %v579_v18 = vadd.f32 0.00028619796, %v578_v7 }
  0xdc   : > { %v616_v8 = vmul.f32 %v1208_v2, %v1208_v2  ;;  %v1218_v9 = vmul.f32 0.70710677, %v1210_v3  ;;  %v474_v10 = vadd.f32 0.112945676, %v473_v4  ;;  %v510_v21 = vadd.f32 0.001143296, %v509_v11 }
  0xdd   : > { %v499_v22 = vadd.f32 0.00028619796, %v498_v12  ;;  %v591_v27 = vmul.f32 %v590_v16, %v1198_v59  ;;  %v463_v28 = vadd.f32 0.05243302, %v462_v17  ;;  %v580_v29 = vmul.f32 %v579_v18, %v1198_v59  ;;  %v250_v4 = vld [vmem:[%s1163_s13 + $0x8] sm:$0xff] }
  0xde   : > { %v1222_v13 = vmin.f32 %v616_v8, 16.0  ;;  %v536_v14 = vmul.f32 %v1218_v9, %v1218_v9  ;;  %v475_v15 = vmul.f32 %v474_v10, %v1177_v45  ;;  %v511_v34 = vmul.f32 %v510_v21, %v1203_v63  ;;  %685 = vmatpush.msra.mxu2 %v250_v4 }
  0xdf   : > { %v500_v36 = vmul.f32 %v499_v22, %v1203_v63  ;;  %v592_v44 = vadd.f32 0.014752088, %v591_v27  ;;  %v464_v47 = vmul.f32 %v463_v28, %v1177_v45  ;;  %v581_v52 = vadd.f32 0.0036580483, %v580_v29 }
  0xe0   : > { %v629_v19 = vmul.f32 3.8918573e-05, %v1222_v13  ;;  %v1229_v20 = vmin.f32 %v536_v14, 16.0  ;;  %v476_v23 = vadd.f32 0.4994258, %v475_v15  ;;  %v249_v14 = vld [vmem:[%s1163_s13] sm:$0xff] }
  0xe1   : > { %v512_v54 = vadd.f32 0.014752088, %v511_v34  ;;  %v501_v60 = vadd.f32 0.0036580483, %v500_v36  ;;  %v593_v62 = vmul.f32 %v592_v44, %v1198_v59  ;;  %v465_v5 = vadd.f32 0.18741608, %v464_v47  ;;  %686 = vmatpush.msra.mxu2 %v249_v14 }
  0xe2   : > { %v630_v25 = vadd.f32 0.001143296, %v629_v19  ;;  %v538_v26 = vmul.f32 2.1237322e-06, %v1229_v20  ;;  %v549_v30 = vmul.f32 3.8918573e-05, %v1229_v20  ;;  %v477_v33 = vmul.f32 %v476_v23, %v1177_v45 }
  0xe3   : > { %v582_v6 = vmul.f32 %v581_v52, %v1198_v59  ;;  %v618_v7 = vmul.f32 2.1237322e-06, %v1222_v13  ;;  %v513_v12 = vmul.f32 %v512_v54, %v1203_v63  ;;  %v502_v16 = vmul.f32 %v501_v60, %v1203_v63 }
  0xe4   : > { %v631_v31 = vmul.f32 %v630_v25, %v1222_v13  ;;  %v539_v32 = vadd.f32 0.00028619796, %v538_v26  ;;  %v550_v37 = vadd.f32 0.001143296, %v549_v30  ;;  %v1243_v43 = vadd.f32 1.0, %v477_v33 }
  0xe5   : > { %v594_v17 = vadd.f32 0.112945676, %v593_v62  ;;  %v514_v22 = vadd.f32 0.112945676, %v513_v12  ;;  %v466_v23 = vmul.f32 %v465_v5, %v1177_v45  ;;  %v583_v24 = vadd.f32 0.05243302, %v582_v6 }
  0xe6   : > { %v632_v39 = vadd.f32 0.014752088, %v631_v31  ;;  %v540_v40 = vmul.f32 %v539_v32, %v1229_v20  ;;  %v551_v48 = vmul.f32 %v550_v37, %v1229_v20  ;;  %931 = vrcp.f32 %v1243_v43 }
  0xe7   : > { %v619_v25 = vadd.f32 0.00028619796, %v618_v7  ;;  %v595_v26 = vmul.f32 %v594_v17, %v1198_v59  ;;  %v515_v30 = vmul.f32 %v514_v22, %v1203_v63  ;;  %v503_v31 = vadd.f32 0.05243302, %v502_v16 }
  0xe8   : > { %v633_v53 = vmul.f32 %v632_v39, %v1222_v13  ;;  %v541_v56 = vadd.f32 0.0036580483, %v540_v40  ;;  %v552_v57 = vadd.f32 0.014752088, %v551_v48  ;;  %v490_v32 = vand.u32 2147483648, %v1243_v43 }
  0xe9   : > { %v596_v33 = vadd.f32 0.4994258, %v595_v26  ;;  %v516_v37 = vadd.f32 0.4994258, %v515_v30  ;;  %v467_v45 = vadd.f32 1.1283791, %v466_v23  ;;  %v620_v39 = vmul.f32 %v619_v25, %v1222_v13 }
  0xea   : > { %v634_v61 = vadd.f32 0.112945676, %v633_v53  ;;  %v553_v1 = vmul.f32 %v552_v57, %v1229_v20  ;;  %v542_v10 = vmul.f32 %v541_v56, %v1229_v20  ;;  %v488_v38 = vand.u32 2147483647, %v1243_v43 }
  0xeb   : > { %v584_v48 = vmul.f32 %v583_v24, %v1198_v59  ;;  %vm484_vm2 = vweird.f32 %v1243_v43  ;;  %v517_v51 = vmul.f32 %v516_v37, %v1203_v63  ;;  %v597_v52 = vmul.f32 %v596_v33, %v1198_v59 }
  0xec   : > { %v635_v8 = vmul.f32 %v634_v61, %v1222_v13  ;;  %v554_v11 = vadd.f32 0.112945676, %v553_v1  ;;  %v932_v15 = vpop.eup %931  ;;  %v543_v27 = vadd.f32 0.05243302, %v542_v10  ;;  %v504_v53 = vmul.f32 %v503_v31, %v1203_v63 }
  0xed   : > { %v480_v21 = vmul.f32 %v932_v15, %v1243_v43  ;;  %vm485_vm1 = vweird.f32 %v932_v15  ;;  %v491_v56 = vor.u32 1.1754944e-38, %v490_v32  ;;  %v468_v57 = vmul.f32 %v467_v45, %v1172_v42 }
  0xee   : > { %v636_v18 = vadd.f32 0.4994258, %v635_v8  ;;  %v555_v19 = vmul.f32 %v554_v11, %v1229_v20  ;;  %v544_v40 = vmul.f32 %v543_v27, %v1229_v20  ;;  %vm486_vm3 = vmor %vm484_vm2, %vm485_vm1  ;;  %vm489_vm4 = vcmp.eq.f32.partialorder %v488_v38, 8.507059e+37 }
  0xef   : > { %v481_v29 = vsub.f32 1.0, %v480_v21  ;;  %v518_v60 = vadd.f32 1.0, %v517_v51  ;;  %v621_v61 = vadd.f32 0.0036580483, %v620_v39  ;;  %v1283_v1 = vadd.f32 1.0, %v597_v52 }
  0xf0   : > { %v556_v28 = vadd.f32 0.4994258, %v555_v19  ;;  %v637_v34 = vmul.f32 %v636_v18, %v1222_v13  ;;  %v545_v62 = vadd.f32 0.18741608, %v544_v40  ;;  %v505_v5 = vadd.f32 0.18741608, %v504_v53  ;;  %v431_v19 = vpop.f32.mrf.mxu1 }
  0xf1   : > { %v482_v36 = vmul.f32 %v932_v15, %v481_v29  ;;  %v585_v6 = vadd.f32 0.18741608, %v584_v48  ;;  %v622_v42 = vmul.f32 %v621_v61, %v1222_v13  ;;  %v446_v11 = vmul.f32 0.5, %v1169_v41 }
  0xf2   : > { %v557_v35 = vmul.f32 %v556_v28, %v1229_v20  ;;  %v1279_v54 = vadd.f32 1.0, %v637_v34  ;;  %v546_v10 = vmul.f32 %v545_v62, %v1229_v20  ;;  %v528_v32 = vand.u32 2147483647, %v518_v60 }
  0xf3   : > { %v483_v47 = vadd.f32 %v932_v15, %v482_v36  ;;  %v586_v17 = vmul.f32 %v585_v6, %v1198_v59  ;;  %v623_v23 = vadd.f32 0.05243302, %v622_v42  ;;  %v530_v33 = vand.u32 2147483648, %v518_v60 }
  0xf4   : > { %v1272_v44 = vadd.f32 1.0, %v557_v35  ;;  %v547_v24 = vadd.f32 1.1283791, %v546_v10  ;;  %vm524_vm10 = vweird.f32 %v518_v60  ;;  %vm529_vm12 = vcmp.eq.f32.partialorder %v528_v32, 8.507059e+37 }
  0xf5   : > { %v487_v58 = vsel %vm486_vm3, %v932_v15, %v483_v47  ;;  %v506_v15 = vmul.f32 %v505_v5, %v1203_v63  ;;  %v624_v37 = vmul.f32 %v623_v23, %v1222_v13  ;;  %v531_v51 = vor.u32 1.1754944e-38, %v530_v33 }
  0xf6   : > { %933 = vrcp.f32 %v1272_v44  ;;  %v492_v43 = vsel %vm489_vm4, %v491_v56, %v487_v58  ;;  %v570_v25 = vand.u32 2147483648, %v1272_v44  ;;  %v568_v27 = vand.u32 2147483647, %v1272_v44 }
  0xf7   : > { %v493_v4 = vmul.f32 %v492_v43, %v468_v57  ;;  %935 = vrcp.f32 %v518_v60  ;;  %v507_v63 = vadd.f32 1.1283791, %v506_v15  ;;  %vm564_vm6 = vweird.f32 %v1272_v44 }
  0xf8   : > { %937 = vrcp.f32 %v1279_v54  ;;  %v571_v34 = vor.u32 1.1754944e-38, %v570_v25  ;;  %v548_v45 = vmul.f32 %v547_v24, %v1218_v9  ;;  %vm569_vm9 = vcmp.eq.f32.partialorder %v568_v27, 8.507059e+37  ;;  %v434_v57 = vpop.f32.mrf.mxu1 }
  0xf9   : > { %v864_v7 = vclamps-f32 %v493_v4, 1.0  ;;  %939 = vrcp.f32 %v1283_v1  ;;  %v508_v47 = vmul.f32 %v507_v63, %v1193_v55  ;;  %v610_v9 = vand.u32 2147483648, %v1283_v1 }
  0xfa   : > { %vm604_vm14 = vweird.f32 %v1283_v1  ;;  %v587_v62 = vadd.f32 1.1283791, %v586_v17  ;;  %v625_v43 = vadd.f32 0.18741608, %v624_v37  ;;  %v448_v17 = vmul.f32 0.5, %v1210_v3 }
  0xfb   : > { %v656_v14 = vadd.f32 1.0, %v864_v7  ;;  %v611_v7 = vor.u32 1.1754944e-38, %v610_v9  ;;  %vm644_vm3 = vweird.f32 %v1279_v54 }
  0xfc   : > { %v934_v8 = vpop.eup %933  ;;  %v588_v10 = vmul.f32 %v587_v62, %v1184_v49 }
  0xfd   : > { %v560_v12 = vmul.f32 %v934_v8, %v1272_v44  ;;  %v936_v16 = vpop.eup %935  ;;  %v661_v21 = vmul.f32 %v656_v14, %v446_v11  ;;  %vm565_vm5 = vweird.f32 %v934_v8  ;;  %v626_v11 = vmul.f32 %v625_v43, %v1222_v13 }
  0xfe   : > { %v1293_v22 = vpop.eup %937  ;;  %v520_v20 = vmul.f32 %v936_v16, %v518_v60  ;;  %vm566_vm7 = vmor %vm564_vm6, %vm565_vm5  ;;  %vm525_vm8 = vweird.f32 %v936_v16  ;;  %v608_v60 = vand.u32 2147483647, %v1283_v1 }
  0xff   : > { %v561_v18 = vsub.f32 1.0, %v560_v12  ;;  %v940_v26 = vpop.eup %939  ;;  %v666_v28 = vmul.f32 %v661_v21, %v431_v19  ;;  %v640_v30 = vmul.f32 %v1293_v22, %v1279_v54  ;;  %vm526_vm11 = vmor %vm524_vm10, %vm525_vm8  ;;  %vm645_vm2 = vweird.f32 %v1293_v22 }
 0x100   : > { %v521_v59 = vsub.f32 1.0, %v520_v20  ;;  %v600_v29 = vmul.f32 %v940_v26, %v1283_v1  ;;  %vm605_vm13 = vweird.f32 %v940_v26  ;;  %vm609_vm1 = vcmp.eq.f32.partialorder %v608_v60, 8.507059e+37  ;;  %vm646_vm4 = vmor %vm644_vm3, %vm645_vm2  ;;  %v437_v49 = vpop.f32.mrf.mxu1 }
 0x101   : > { %v562_v41 = vmul.f32 %v934_v8, %v561_v18  ;;  %687 = vmatmul.f32.vlgmr.msra.gmra.mxu2 %v666_v28  ;;  %v641_v48 = vsub.f32 1.0, %v640_v30  ;;  %vm606_vm15 = vmor %vm604_vm14, %vm605_vm13  ;;  %v627_v13 = vadd.f32 1.1283791, %v626_v11 }
 0x102   : > { %v522_v35 = vmul.f32 %v936_v16, %v521_v59  ;;  %v601_v36 = vsub.f32 1.0, %v600_v29 }
 0x103   : > { %v563_v31 = vadd.f32 %v934_v8, %v562_v41  ;;  %v642_v55 = vmul.f32 %v1293_v22, %v641_v48 }
 0x104   : > { %v523_v40 = vadd.f32 %v936_v16, %v522_v35  ;;  %v602_v44 = vmul.f32 %v940_v26, %v601_v36 }
 0x105   : > { %v567_v38 = vsel %vm566_vm7, %v934_v8, %v563_v31  ;;  %v447_v8 = vmul.f32 0.5, %v1186_v50  ;;  %v643_v1 = vadd.f32 %v1293_v22, %v642_v55  ;;  %v648_v50 = vand.u32 2147483647, %v1279_v54 }
 0x106   : > { %v572_v39 = vsel %vm569_vm9, %v571_v34, %v567_v38  ;;  %v527_v53 = vsel %vm526_vm11, %v936_v16, %v523_v40  ;;  %v603_v56 = vadd.f32 %v940_v26, %v602_v44  ;;  %v650_v16 = vand.u32 2147483648, %v1279_v54 }
 0x107   : > { %v573_v52 = vmul.f32 %v572_v39, %v548_v45  ;;  %v532_v58 = vsel %vm529_vm12, %v531_v51, %v527_v53  ;;  %v647_v21 = vsel %vm646_vm4, %v1293_v22, %v643_v1  ;;  %vm649_vm5 = vcmp.eq.f32.partialorder %v648_v50, 8.507059e+37 }
 0x108   : > { %v533_v61 = vmul.f32 %v532_v58, %v508_v47  ;;  %v607_v6 = vsel %vm606_vm15, %v940_v26, %v603_v56  ;;  %v651_v24 = vor.u32 1.1754944e-38, %v650_v16  ;;  %v628_v26 = vmul.f32 %v627_v13, %v1208_v2  ;;  %v440_v28 = vpop.f32.mrf.mxu1 }
 0x109   : > { %v866_v5 = vclamps-f32 %v573_v52, 1.0  ;;  %v612_v12 = vsel %vm609_vm1, %v611_v7, %v607_v6  ;;  %v449_v54 = vmul.f32 0.5, %v1179_v46  ;;  %v450_v22 = vmul.f32 0.5, %v1205_v0 }
 0x10a   : > { %v865_v4 = vclamps-f32 %v533_v61, 1.0  ;;  %v613_v19 = vmul.f32 %v612_v12, %v588_v10  ;;  %v652_v20 = vsel %vm649_vm5, %v651_v24, %v647_v21 }
 0x10b   : > { %v658_v15 = vadd.f32 1.0, %v866_v5  ;;  %v653_v41 = vmul.f32 %v652_v20, %v628_v26 }
 0x10c   : > { %v657_v42 = vadd.f32 1.0, %v865_v4  ;;  %v867_v25 = vclamps-f32 %v613_v19, 1.0 }
 0x10d   : > { %v663_v23 = vmul.f32 %v658_v15, %v448_v17  ;;  %v868_v59 = vclamps-f32 %v653_v41, 1.0 }
 0x10e   : > { %v662_v14 = vmul.f32 %v657_v42, %v447_v8  ;;  %v659_v27 = vadd.f32 1.0, %v867_v25 }
 0x10f   : > { %v668_v3 = vmul.f32 %v663_v23, %v437_v49  ;;  %v660_v30 = vadd.f32 1.0, %v868_v59 }
 0x110   : > { %v667_v18 = vmul.f32 %v662_v14, %v434_v57  ;;  %v664_v63 = vmul.f32 %v659_v27, %v449_v54  ;;  %v443_v32 = vpop.f32.mrf.mxu1 }
 0x111   : > { %v665_v31 = vmul.f32 %v660_v30, %v450_v22 }
 0x112   : > { %690 = vmatmul.f32.gmra.mxu2 %v667_v18  ;;  %v669_v29 = vmul.f32 %v664_v63, %v440_v28 }
 0x113   : > { %v670_v33 = vmul.f32 %v665_v31, %v443_v32 }
 0x11a   : > { %693 = vmatmul.f32.gmra.mxu2 %v668_v3 }
 0x122   : > { %696 = vmatmul.f32.gmra.mxu2 %v669_v29 }
 0x12a   : > { %699 = vmatmul.f32.gmra.mxu2 %v670_v33 }
 0x184   : > { %v688_v34 = vpop.f32.mrf.mxu2 }
 0x195   : > { %v691_v2 = vpop.f32.mrf.mxu2 }
 0x19d   : > { %v694_v35 = vpop.f32.mrf.mxu2 }
 0x1a5   : > { %v697_v36 = vpop.f32.mrf.mxu2 }
 0x1a9   : > { %706 = sbr.rel (%p869_p6) target bundleno = 436 (0x1b4), region = 40 }
 0x1ad   : > { %v700_v37 = vpop.f32.mrf.mxu2 }
 0x1ae   : > { %v981_v46 = vmov 0.0  }
 0x1af   : > { %707 = vst.msk [vmem:[#allocation2] sm:$0xff] %vm270_vm0, %v981_v46 }
 0x1b0   : > { %708 = vst.msk [vmem:[#allocation2 + $0x8] sm:$0xff] %vm270_vm0, %v981_v46 }
 0x1b1   : > { %709 = vst.msk [vmem:[#allocation2 + $0x10] sm:$0xff] %vm270_vm0, %v981_v46 }
 0x1b2   : > { %710 = vst.msk [vmem:[#allocation2 + $0x18] sm:$0xff] %vm270_vm0, %v981_v46 }
 0x1b3   : > { %711 = vst.msk [vmem:[#allocation2 + $0x20] sm:$0xff] %vm270_vm0, %v981_v46 }
 0x1b4 PF: > { %p870_p7 = scmp.ge.s32.totalorder %s963_s15, 1 }
 0x1b6   : > { %v712_v0 = vld [vmem:[#allocation2] sm:$0xff] }
 0x1b7   : > { %v713_v45 = vld [vmem:[#allocation2 + $0x8] sm:$0xff]  ;;  %v717_v44 = vadd.f32 %v712_v0, %v688_v34  ;;  %725 = sbr.rel (%p870_p7) target bundleno = 449 (0x1c1), region = 44 }
 0x1b8   : > { %v714_v38 = vld [vmem:[#allocation2 + $0x10] sm:$0xff]  ;;  %v718_v47 = vadd.f32 %v713_v45, %v691_v2 }
 0x1b9   : > { %v715_v39 = vld [vmem:[#allocation2 + $0x18] sm:$0xff]  ;;  %v719_v48 = vadd.f32 %v714_v38, %v694_v35 }
 0x1ba   : > { %v716_v40 = vld [vmem:[#allocation2 + $0x20] sm:$0xff]  ;;  %v720_v51 = vadd.f32 %v715_v39, %v697_v36 }
 0x1bb   : > { %v721_v52 = vadd.f32 %v716_v40, %v700_v37 }
 0x1bc   : > { %726 = vst.msk [vmem:[#allocation2] sm:$0xff] %vm270_vm0, %v717_v44 }
 0x1bd   : > { %727 = vst.msk [vmem:[#allocation2 + $0x8] sm:$0xff] %vm270_vm0, %v718_v47 }
 0x1be   : > { %728 = vst.msk [vmem:[#allocation2 + $0x10] sm:$0xff] %vm270_vm0, %v719_v48 }
 0x1bf   : > { %729 = vst.msk [vmem:[#allocation2 + $0x18] sm:$0xff] %vm270_vm0, %v720_v51 }
 0x1c0   : > { %730 = vst.msk [vmem:[#allocation2 + $0x20] sm:$0xff] %vm270_vm0, %v721_v52 }
 0x1c1 PF: > { %p871_p8 = scmp.ne.s32.totalorder %s963_s15, 1 }
 0x1c3   : > { %734 = sbr.rel (%p871_p8) target bundleno = 461 (0x1cd), region = 48 }
 0x1c8   : > { %735 = vst.msk [vmem:[%s1071_s7] sm:$0xff] %vm270_vm0, %v717_v44 }
 0x1c9   : > { %736 = vst.msk [vmem:[%s1071_s7 + $0x8] sm:$0xff] %vm270_vm0, %v718_v47 }
 0x1ca   : > { %737 = vst.msk [vmem:[%s1071_s7 + $0x10] sm:$0xff] %vm270_vm0, %v719_v48 }
 0x1cb   : > { %738 = vst.msk [vmem:[%s1071_s7 + $0x18] sm:$0xff] %vm270_vm0, %v720_v51 }
 0x1cc   : > { %739 = vst.msk [vmem:[%s1071_s7 + $0x20] sm:$0xff] %vm270_vm0, %v721_v52 }
 0x1cd PF: > { %s14_s19 = sadd.s32 1, %s979_s19   ;;  %s1364_s15 = smov %s971_s17 }
 0x1ce   : > { %p11_p9 = scmp.ge.s32.totalorder %s14_s19, 6   ;;  %s1365_s16 = smov %s975_s18 }
 0x1cf   : > { %s1366_s17 = smov %s1369_s20  ;;  %s1367_s18 = smov %s1373_s21 }
 0x1d0   :  { %13 = sbr.rel (!%p11_p9) target bundleno = 3 (0x3), region = 81 }

</bundles_post_ra>
